<compile_context>
chip_gen: v7x
topology: tpu7x:2x2x1
jax: 0.10.0
libtpu: 0.0.40
codegen_flags: <defaults>
</compile_context>

<pallas_src>
import functools
import math

import jax
import jax.numpy as jnp
from jax.experimental import pallas as pl
from jax.experimental.pallas import tpu as pltpu


# ----------------------------------------------------------------------------
# Generation-aware sizing (v5e/v6e: 128 MiB VMEM, v7x: 64 MiB per TC)
# ----------------------------------------------------------------------------
def _tpu_vmem_capacity_bytes():
    try:
        return int(pltpu.get_tpu_info().vmem_capacity_bytes)
    except Exception:
        return 64 * 1024 * 1024          # conservative fallback (v7x per-TC)


_VMEM_CAP = _tpu_vmem_capacity_bytes()
_BIG_VMEM = _VMEM_CAP >= 96 * 1024 * 1024
_VMEM_LIMIT = min(int(0.75 * _VMEM_CAP), 100 * 1024 * 1024)
_ROW_TILE_PREF = 1024 if _BIG_VMEM else 512     # K1/K4 row tiles
_STRIP_ROW_CAP = 2048 if _BIG_VMEM else 1024    # K2 im2col rows per strip


# ----------------------------------------------------------------------------
# Tiling helpers
# ----------------------------------------------------------------------------
def _round_up(x, m):
    return ((x + m - 1) // m) * m


def _largest_divisor_tile(m, pref, mult):
    """Largest multiple-of-`mult` divisor of m that is <= pref, else None."""
    if m % mult == 0 and m <= pref:
        return m
    t = (pref // mult) * mult
    while t >= mult:
        if m % t == 0:
            return t
        t -= mult
    return None


def _pick_divisor_tile(m, pref, sub=8):
    """Try sublane multiples of `sub` (16 for bf16) first, then 8."""
    for mult in ((sub, 8) if sub != 8 else (8,)):
        t = _largest_divisor_tile(m, pref, mult)
        if t is not None:
            return t
    return None


def _pick_lane_tile(c, pref=256):
    """Cout tile: a multiple of 128 lanes (256 = v6e/v7x MXU width) or full."""
    return pref if (c > pref and c % pref == 0) else c


def _pick_group_chunk(wb, gsize):
    """Smallest channel chunk dividing wb that is a multiple of the group size
    and of 128 lanes -> minimizes block-diagonal zero FLOPs on the MXU."""
    step = gsize * 128 // math.gcd(gsize, 128)      # lcm(gsize, 128)
    c = step
    while c < wb:
        if wb % c == 0:
            return c
        c += step
    return wb


def _pick_strip_rows(ho, wo):
    """Output rows per in-kernel strip: divisor of Ho keeping Rs*Wo bounded."""
    cap = max(1, _STRIP_ROW_CAP // max(wo, 1))
    best = 1
    for r in range(1, ho + 1):
        if ho % r == 0 and r <= cap:
            best = r
    return best


# ----------------------------------------------------------------------------
# Kernel 1: 1x1 conv (matmul) + folded-BN affine + optional ReLU
# ----------------------------------------------------------------------------
def _conv1x1_bn_kernel(x_ref, w_ref, s_ref, b_ref, o_ref, *, relu):
    y = jnp.dot(x_ref[...], w_ref[...], preferred_element_type=jnp.float32)
    y = y * s_ref[...] + b_ref[...]                 # f32 epilogue
    if relu:
        y = jnp.maximum(y, 0.0)
    o_ref[...] = y.astype(o_ref.dtype)


def conv1x1_bn(x2d, w, scale, bias, *, relu, out_dtype, sub=8):
    M, Cin = x2d.shape
    Cout = w.shape[1]
    tn = _pick_lane_tile(Cout)

    tm = _pick_divisor_tile(M, _ROW_TILE_PREF, sub)
    if tm is None:
        # TODO(synk): mask the ragged last block instead of this extra pad pass.
        tm = min(_ROW_TILE_PREF, _round_up(M, 8))
        Mp = _round_up(M, tm)
        x_in = jnp.pad(x2d, ((0, Mp - M), (0, 0)))
    else:
        Mp, x_in = M, x2d

    out = pl.pallas_call(
        functools.partial(_conv1x1_bn_kernel, relu=relu),
        out_shape=jax.ShapeDtypeStruct((Mp, Cout), out_dtype),
        grid=(Mp // tm, Cout // tn),
        in_specs=[
            pl.BlockSpec((tm, Cin), lambda i, j: (i, 0)),
            pl.BlockSpec((Cin, tn), lambda i, j: (0, j)),
            pl.BlockSpec((1, tn), lambda i, j: (0, j)),
            pl.BlockSpec((1, tn), lambda i, j: (0, j)),
        ],
        out_specs=pl.BlockSpec((tm, tn), lambda i, j: (i, j)),
        compiler_params=pltpu.CompilerParams(
            dimension_semantics=("parallel", "parallel"),
            vmem_limit_bytes=_VMEM_LIMIT),
    )(x_in, w, scale.reshape(1, Cout), bias.reshape(1, Cout))
    return out if Mp == M else out[:M]


# ----------------------------------------------------------------------------
# Kernel 2: grouped 3x3 conv (stride, pad=1) + folded-BN + ReLU + SE avg-pool.
# Grid = (channel-chunk, image) so the weight slab stays VMEM-resident over N.
# Inside the kernel, output rows are processed in strips (bounded im2col slab).
# ----------------------------------------------------------------------------
def _grouped_conv3x3_kernel(x_ref, w_ref, s_ref, b_ref, o_ref, pool_ref,
                            xpad_ref, *, stride, H, W, Ho, Wo, Rs):
    C = x_ref.shape[-1]                               # channel-chunk width
    rows_in = (Rs - 1) * stride + 3                   # padded rows per strip
    n_strips = Ho // Rs

    # pad=1 in VMEM: zero ONLY the 1-px border (interior fully overwritten).
    zrow = jnp.zeros((1, W + 2, C), xpad_ref.dtype)
    xpad_ref[0:1] = zrow
    xpad_ref[H + 1:H + 2] = zrow
    zcol = jnp.zeros((H + 2, 1, C), xpad_ref.dtype)
    xpad_ref[:, 0:1, :] = zcol
    xpad_ref[:, W + 1:W + 2, :] = zcol
    # TODO(synk): DMA the HBM tile straight into xpad's interior
    # (memory_space=pl.ANY + double-buffered make_async_copy) to drop this
    # VMEM->VMEM copy and its shifted stores.
    xpad_ref[1:H + 1, 1:W + 1, :] = x_ref[0]

    pool_ref[0] = jnp.zeros((1, C), pool_ref.dtype)

    def strip(q, carry):
        row0 = pl.multiple_of(q * (Rs * stride), Rs * stride)
        xs = xpad_ref[pl.ds(row0, rows_in), :, :]     # (rows_in, W+2, C)

        if stride == 1:
            def tap(kh, kw):
                return xs[kh:kh + Rs, kw:kw + Wo, :]
        elif stride == 2:
            # De-interleave H and W once; every tap becomes an unstrided slice.
            xe, xo = xs[0::2], xs[1::2]
            planes = ((xe[:, 0::2, :], xe[:, 1::2, :]),
                      (xo[:, 0::2, :], xo[:, 1::2, :]))

            def tap(kh, kw):
                p = planes[kh % 2][kw % 2]
                return p[kh // 2:kh // 2 + Rs, kw // 2:kw // 2 + Wo, :]
        else:  # generic-stride fallback (not used by RegNet configs)
            def tap(kh, kw):
                return jax.lax.slice(
                    xs, (kh, kw, 0),
                    (kh + (Rs - 1) * stride + 1, kw + (Wo - 1) * stride + 1, C),
                    (stride, stride, 1))

        # TODO(synk): on v7x (MRB in-place accumulation) replace the concat +
        # single K=9*C matmul with 9 accumulated dots (one per tap).
        patches = jnp.concatenate(
            [tap(kh, kw) for kh in range(3) for kw in range(3)],
            axis=-1).reshape(Rs * Wo, 9 * C)          # (Rs*Wo, 9C)

        y = jnp.dot(patches, w_ref[0], preferred_element_type=jnp.float32)
        y = y * s_ref[...] + b_ref[...]               # f32 epilogue
        y = jnp.maximum(y, 0.0)

        out0 = pl.multiple_of(q * (Rs * Wo), Rs * Wo)
        o_ref[0, pl.ds(out0, Rs * Wo), :] = y.astype(o_ref.dtype)
        pool_ref[0] += jnp.sum(y, axis=0, keepdims=True)   # SE pool (f32)
        return carry

    jax.lax.fori_loop(0, n_strips, strip, 0)
    pool_ref[0] = pool_ref[0] * (1.0 / (Ho * Wo))


def grouped_conv3x3_bn_relu_pool(x, w_chunks, scale, bias, *, stride, out_dtype):
    N, H, W, Call = x.shape
    nchunk, K9, cg = w_chunks.shape
    Ho = (H + 2 - 3) // stride + 1
    Wo = (W + 2 - 3) // stride + 1
    Rs = _pick_strip_rows(Ho, Wo)

    kernel = functools.partial(_grouped_conv3x3_kernel,
                               stride=stride, H=H, W=W, Ho=Ho, Wo=Wo, Rs=Rs)
    y, pooled = pl.pallas_call(
        kernel,
        out_shape=(jax.ShapeDtypeStruct((N, Ho * Wo, Call), out_dtype),
                   jax.ShapeDtypeStruct((N, 1, Call), jnp.float32)),
        grid=(nchunk, N),   # weight-chunk OUTER -> weight VMEM-resident over N
        in_specs=[
            pl.BlockSpec((1, H, W, cg), lambda c, n: (n, 0, 0, c)),
            pl.BlockSpec((1, K9, cg), lambda c, n: (c, 0, 0)),
            pl.BlockSpec((1, cg), lambda c, n: (0, c)),
            pl.BlockSpec((1, cg), lambda c, n: (0, c)),
        ],
        out_specs=(
            pl.BlockSpec((1, Ho * Wo, cg), lambda c, n: (n, 0, c)),
            pl.BlockSpec((1, 1, cg), lambda c, n: (n, 0, c)),
        ),
        scratch_shapes=[pltpu.VMEM((H + 2, W + 2, cg), x.dtype)],
        compiler_params=pltpu.CompilerParams(
            dimension_semantics=("parallel", "parallel"),
            vmem_limit_bytes=_VMEM_LIMIT),
    )(x, w_chunks, scale.reshape(1, Call), bias.reshape(1, Call))
    return y, pooled


# ----------------------------------------------------------------------------
# Kernel 3: SE excitation FCs (pooled -> FC -> ReLU -> FC -> sigmoid), batched
# over all N images in a single tiny kernel.
# ----------------------------------------------------------------------------
def _se_fc_kernel(p_ref, w1_ref, b1_ref, w2_ref, b2_ref, g_ref):
    h = jnp.dot(p_ref[...].astype(w1_ref.dtype), w1_ref[...],
                preferred_element_type=jnp.float32) + b1_ref[...]
    h = jnp.maximum(h, 0.0)
    z = jnp.dot(h.astype(w2_ref.dtype), w2_ref[...],
                preferred_element_type=jnp.float32) + b2_ref[...]
    g_ref[...] = 1.0 / (1.0 + jnp.exp(-z))            # exact sigmoid, f32


def se_gate(pooled, w1, b1, w2, b2):
    N, C = pooled.shape
    Cse = w1.shape[1]
    return pl.pallas_call(
        _se_fc_kernel,
        out_shape=jax.ShapeDtypeStruct((N, C), jnp.float32),
    )(pooled, w1, b1.reshape(1, Cse), w2, b2.reshape(1, C))


# ----------------------------------------------------------------------------
# Kernel 4: final 1x1 conv + folded-BN (no ReLU) with the SE gate fused in.
# The gated input is computed ONCE per (n, row-block) into a VMEM scratch
# (under pl.when(j == 0)) and reused for every output-channel tile.
# ----------------------------------------------------------------------------
def _conv1x1_gate_bn_kernel(x_ref, g_ref, w_ref, s_ref, b_ref, o_ref, xg_ref):
    @pl.when(pl.program_id(2) == 0)
    def _():
        xg_ref[...] = (x_ref[0].astype(jnp.float32) * g_ref[0]).astype(xg_ref.dtype)

    y = jnp.dot(xg_ref[...], w_ref[...], preferred_element_type=jnp.float32)
    y = y * s_ref[...] + b_ref[...]                   # f32 epilogue
    o_ref[0] = y.astype(o_ref.dtype)


def conv1x1_gate_bn(x3d, gate, w, scale, bias, *, out_dtype, sub=8):
    N, HW, Cin = x3d.shape
    Cout = w.shape[1]
    thw = _pick_divisor_tile(HW, _ROW_TILE_PREF, sub)
    if thw is None:
        # TODO(synk): pad/mask ragged HW; a full-extent block can exceed VMEM
        # for very large feature maps.
        thw = HW
    tn = _pick_lane_tile(Cout)
    return pl.pallas_call(
        _conv1x1_gate_bn_kernel,
        out_shape=jax.ShapeDtypeStruct((N, HW, Cout), out_dtype),
        grid=(N, HW // thw, Cout // tn),
        in_specs=[
            pl.BlockSpec((1, thw, Cin), lambda n, h, j: (n, h, 0)),
            pl.BlockSpec((1, 1, Cin), lambda n, h, j: (n, 0, 0)),
            pl.BlockSpec((Cin, tn), lambda n, h, j: (0, j)),
            pl.BlockSpec((1, tn), lambda n, h, j: (0, j)),
            pl.BlockSpec((1, tn), lambda n, h, j: (0, j)),
        ],
        out_specs=pl.BlockSpec((1, thw, tn), lambda n, h, j: (n, h, j)),
        scratch_shapes=[pltpu.VMEM((thw, Cin), x3d.dtype)],
        compiler_params=pltpu.CompilerParams(
            dimension_semantics=("parallel", "parallel", "arbitrary"),
            vmem_limit_bytes=_VMEM_LIMIT),
    )(x3d, gate, w, scale.reshape(1, Cout), bias.reshape(1, Cout))


# ----------------------------------------------------------------------------
# Parameter construction (deterministic, mirrors BottleneckTransform.__init__)
# ----------------------------------------------------------------------------
def make_params(key, in_c, out_c, bottleneck_multiplier, group_width, se_ratio):
    wb = int(round(out_c * bottleneck_multiplier))
    gwm = max(1, group_width)
    ng = max(1, wb // gwm) if wb > 0 else 1
    wb = max(ng, int(round(wb / ng) * ng)) if ng > 0 else 1
    wb = max(wb, 1)
    gsize = wb // ng
    se_c = max(1, int(round(in_c * se_ratio)))

    cg = _pick_group_chunk(wb, gsize)                # minimal >=128-lane chunk
    nchunk = wb // cg
    gpc = cg // gsize                                # groups per chunk

    keys = jax.random.split(key, 20)
    p = {"meta": dict(wb=wb, ng=ng, gsize=gsize, se_c=se_c, cg=cg, nchunk=nchunk)}

    p["w1"] = jax.random.normal(keys[0], (in_c, wb), jnp.float32) * 0.1
    p["wg2"] = jax.random.normal(keys[1], (ng, 3, 3, gsize, gsize), jnp.float32) * 0.1
    p["w3"] = jax.random.normal(keys[2], (wb, out_c), jnp.float32) * 0.1

    # Per-chunk block-diagonal im2col weights: (nchunk, 9*cg, cg).
    chunks = []
    for c in range(nchunk):
        blk = jnp.zeros((3, 3, cg, cg), jnp.float32)
        for gi in range(gpc):
            g = c * gpc + gi
            blk = blk.at[:, :, gi * gsize:(gi + 1) * gsize,
                         gi * gsize:(gi + 1) * gsize].set(p["wg2"][g])
        chunks.append(blk.reshape(9 * cg, cg))
    p["w2_chunks"] = jnp.stack(chunks)

    def bn_fold(kg, kb, km, kv, c):
        gamma = 1.0 + 0.1 * jax.random.normal(kg, (c,), jnp.float32)
        beta = 0.1 * jax.random.normal(kb, (c,), jnp.float32)
        mean = 0.1 * jax.random.normal(km, (c,), jnp.float32)
        var = jnp.abs(jax.random.normal(kv, (c,), jnp.float32)) + 0.5
        scale = gamma / jnp.sqrt(var + 1e-5)
        bias = beta - mean * scale
        return scale, bias

    p["s1"], p["b1"] = bn_fold(keys[3], keys[4], keys[5], keys[6], wb)
    p["s2"], p["b2"] = bn_fold(keys[7], keys[8], keys[9], keys[10], wb)
    p["s3"], p["b3"] = bn_fold(keys[11], keys[12], keys[13], keys[14], out_c)

    p["se_w1"] = jax.random.normal(keys[15], (wb, se_c), jnp.float32) * 0.1
    p["se_b1"] = jax.random.normal(keys[16], (se_c,), jnp.float32) * 0.1
    p["se_w2"] = jax.random.normal(keys[17], (se_c, wb), jnp.float32) * 0.1
    p["se_b2"] = jax.random.normal(keys[18], (wb,), jnp.float32) * 0.1
    return p


# ----------------------------------------------------------------------------
# Forward wrapper.  data_format="NCHW" matches the PyTorch module; "NHWC"
# skips the entry/exit transposes (use it to keep a full network NHWC).
# ----------------------------------------------------------------------------
def bottleneck_transform(x, p, *, stride, compute_dtype=jnp.bfloat16,
                         data_format="NCHW"):
    if data_format == "NCHW":
        x_nhwc = jnp.transpose(x, (0, 2, 3, 1))
    else:
        x_nhwc = x
    N, H, W, Cin = x_nhwc.shape
    wb = p["meta"]["wb"]
    out_c = p["w3"].shape[1]
    cd = compute_dtype
    sub = 16 if cd == jnp.bfloat16 else 8

    xc = x_nhwc.astype(cd)

    # conv_block1: 1x1 conv + BN + ReLU
    y1 = conv1x1_bn(xc.reshape(-1, Cin), p["w1"].astype(cd), p["s1"], p["b1"],
                    relu=True, out_dtype=cd, sub=sub)
    y1 = y1.reshape(N, H, W, wb)

    # conv_block2: grouped 3x3 conv (stride, pad=1) + BN + ReLU, + SE avg-pool
    y2, pooled = grouped_conv3x3_bn_relu_pool(
        y1, p["w2_chunks"].astype(cd), p["s2"], p["b2"],
        stride=stride, out_dtype=cd)
    Ho = (H - 1) // stride + 1
    Wo = (W - 1) // stride + 1

    # SE excitation FCs -> per-image channel gate (f32)
    gate = se_gate(pooled.reshape(N, wb), p["se_w1"].astype(cd), p["se_b1"],
                   p["se_w2"].astype(cd), p["se_b2"])

    # conv3 (1x1) + bn3 (no ReLU) with SE gate fused into the matmul input
    z = conv1x1_gate_bn(y2, gate.reshape(N, 1, wb),
                        p["w3"].astype(cd), p["s3"], p["b3"],
                        out_dtype=x.dtype, sub=sub)
    z = z.reshape(N, Ho, Wo, out_c)
    if data_format == "NCHW":
        z = jnp.transpose(z, (0, 3, 1, 2))
    return z


# ----------------------------------------------------------------------------
# Pure-JAX reference (for correctness check), NCHW like the PyTorch module.
# ----------------------------------------------------------------------------
def ref_forward(x, p, *, stride):
    ng, gsize = p["meta"]["ng"], p["meta"]["gsize"]

    def bn(y, s, b):
        return y * s[None, :, None, None] + b[None, :, None, None]

    dn = ("NCHW", "OIHW", "NCHW")
    y = jax.lax.conv_general_dilated(
        x, jnp.transpose(p["w1"])[:, :, None, None], (1, 1), "VALID",
        dimension_numbers=dn)
    y = jax.nn.relu(bn(y, p["s1"], p["b1"]))

    w2_oihw = jnp.transpose(p["wg2"], (0, 4, 3, 1, 2)).reshape(ng * gsize, gsize, 3, 3)
    y = jax.lax.conv_general_dilated(
        y, w2_oihw, (stride, stride), ((1, 1), (1, 1)),
        dimension_numbers=dn, feature_group_count=ng)
    y = jax.nn.relu(bn(y, p["s2"], p["b2"]))

    pooled = jnp.mean(y, axis=(2, 3), keepdims=True)
    h = jax.nn.relu(jnp.einsum("ncij,cd->ndij", pooled, p["se_w1"])
                    + p["se_b1"][None, :, None, None])
    g = jax.nn.sigmoid(jnp.einsum("ndij,dc->ncij", h, p["se_w2"])
                       + p["se_b2"][None, :, None, None])
    y = y * g

    y = jax.lax.conv_general_dilated(
        y, jnp.transpose(p["w3"])[:, :, None, None], (1, 1), "VALID",
        dimension_numbers=dn)
    return bn(y, p["s3"], p["b3"])


if __name__ == "__main__":
    key = jax.random.PRNGKey(0)
    kx, kp = jax.random.split(key)

    N, Cin, H, W = 2, 8, 16, 16
    out_c, bm, gw, se_ratio = 16, 1.0, 4, 0.25

    x = jax.random.normal(kx, (N, Cin, H, W), jnp.float32)
    params = make_params(kp, Cin, out_c, bm, gw, se_ratio)

    # f32 compute path: strict check against the pure-JAX reference.
    for stride in (2, 1):
        out = bottleneck_transform(x, params, stride=stride,
                                   compute_dtype=jnp.float32)
        out = jax.block_until_ready(out)
        ref = ref_forward(x, params, stride=stride)
        assert out.shape == ref.shape, (out.shape, ref.shape)
        assert jnp.allclose(out, ref, atol=1e-4, rtol=1e-4), (
            stride, float(jnp.max(jnp.abs(out - ref))))

    # bf16 matmul-operand path (production default): loose tolerance vs f32 ref.
    ref2 = ref_forward(x, params, stride=2)
    out_bf16 = bottleneck_transform(x, params, stride=2,
                                    compute_dtype=jnp.bfloat16)
    out_bf16 = jax.block_until_ready(out_bf16).astype(jnp.float32)
    assert jnp.allclose(out_bf16, ref2, atol=5e-2, rtol=5e-2), float(
        jnp.max(jnp.abs(out_bf16 - ref2)))

    print("KERNEL_OK")
</pallas_src>

<mosaic_0001>
module attributes {stable_mosaic.version = 11 : i64} {
  func.func @_conv1x1_bn_kernel(%arg0: i32, %arg1: i32, %arg2: memref<512x8xf32, #tpu.memory_space<vmem>>, %arg3: memref<8x16xf32, #tpu.memory_space<vmem>>, %arg4: memref<1x16xf32, #tpu.memory_space<vmem>>, %arg5: memref<1x16xf32, #tpu.memory_space<vmem>>, %arg6: memref<512x16xf32, #tpu.memory_space<vmem>>) attributes {dimension_semantics = [#tpu.dimension_semantics<parallel>, #tpu.dimension_semantics<parallel>], iteration_bounds = array<i64: 1, 1>, scalar_prefetch = 0 : i64, scratch_operands = 0 : i64, tpu.core_type = #tpu.core_type<tc>, window_params = [{transform_indices = @transform_0, window_bounds = array<i64: 512, 8>}, {transform_indices = @transform_1, window_bounds = array<i64: 8, 16>}, {transform_indices = @transform_2, window_bounds = array<i64: 1, 16>}, {transform_indices = @transform_3, window_bounds = array<i64: 1, 16>}, {transform_indices = @transform_4, window_bounds = array<i64: 512, 16>}]} {
    %c0 = arith.constant 0 : index
    %c0_0 = arith.constant 0 : index
    %0 = vector.load %arg2[%c0, %c0_0] : memref<512x8xf32, #tpu.memory_space<vmem>>, vector<512x8xf32>
    %c0_1 = arith.constant 0 : index
    %c0_2 = arith.constant 0 : index
    %1 = vector.load %arg3[%c0_1, %c0_2] : memref<8x16xf32, #tpu.memory_space<vmem>>, vector<8x16xf32>
    %cst = arith.constant dense<0.000000e+00> : vector<512x16xf32>
    %2 = tpu.matmul %0, %1, %cst {dimension_numbers = #tpu.dot_dimension_numbers<[1], [0], [0], [1], [0, 0, 1, 1], [], []>} : vector<512x8xf32>, vector<8x16xf32>, vector<512x16xf32> -> vector<512x16xf32>
    %c0_3 = arith.constant 0 : index
    %c0_4 = arith.constant 0 : index
    %3 = vector.load %arg4[%c0_3, %c0_4] : memref<1x16xf32, #tpu.memory_space<vmem>>, vector<1x16xf32>
    %4 = vector.broadcast %3 : vector<1x16xf32> to vector<512x16xf32>
    %5 = arith.mulf %2, %4 : vector<512x16xf32>
    %c0_5 = arith.constant 0 : index
    %c0_6 = arith.constant 0 : index
    %6 = vector.load %arg5[%c0_5, %c0_6] : memref<1x16xf32, #tpu.memory_space<vmem>>, vector<1x16xf32>
    %7 = vector.broadcast %6 : vector<1x16xf32> to vector<512x16xf32>
    %8 = arith.addf %5, %7 : vector<512x16xf32>
    %cst_7 = arith.constant 0.000000e+00 : f32
    %9 = vector.broadcast %cst_7 : f32 to vector<512x16xf32>
    %10 = arith.maximumf %8, %9 : vector<512x16xf32>
    %c0_8 = arith.constant 0 : index
    %c0_9 = arith.constant 0 : index
    %11 = vector.load %arg6[%c0_8, %c0_9] : memref<512x16xf32, #tpu.memory_space<vmem>>, vector<512x16xf32>
    tpu.vector_store %arg6[%c0_8, %c0_9], %10 {strides = array<i32>} : memref<512x16xf32, #tpu.memory_space<vmem>>, vector<512x16xf32>,
    return
  }
  func.func @transform_0(%arg0: i32, %arg1: i32) -> (i32, i32) {
    %c0_i32 = arith.constant 0 : i32
    %c0_i32_0 = arith.constant 0 : i32
    return %arg0, %c0_i32 : i32, i32
  }
  func.func @transform_1(%arg0: i32, %arg1: i32) -> (i32, i32) {
    %c0_i32 = arith.constant 0 : i32
    %c0_i32_0 = arith.constant 0 : i32
    return %c0_i32, %arg1 : i32, i32
  }
  func.func @transform_2(%arg0: i32, %arg1: i32) -> (i32, i32) {
    %c0_i32 = arith.constant 0 : i32
    %c0_i32_0 = arith.constant 0 : i32
    return %c0_i32, %arg1 : i32, i32
  }
  func.func @transform_3(%arg0: i32, %arg1: i32) -> (i32, i32) {
    %c0_i32 = arith.constant 0 : i32
    %c0_i32_0 = arith.constant 0 : i32
    return %c0_i32, %arg1 : i32, i32
  }
  func.func @transform_4(%arg0: i32, %arg1: i32) -> (i32, i32) {
    %c0_i32 = arith.constant 0 : i32
    return %arg0, %arg1 : i32, i32
  }
}

</mosaic_0001>

<bundles_post_ra>
// kernel: tpu_custom_call.1
= control target key start
LH: loop header
LB: loop body
LE: loop exit
PB: predicated region body
PF: predicated region fallthrough
CT: control target
= control target key end

     0   :  { %vm82_vm0 = vcmask 64512   ;;  %vm866_vm1 = vcmask 130048   ;;  %s1844_s1 = inlined_call_operand.vmem [shape: f32[8,16], index: 1, kind: input, shape index: {}]   ;;  %s1845_s0 = inlined_call_operand.vmem [shape: f32[512,8], index: 0, kind: input, shape index: {}]   ;;  %s1846_s2 = inlined_call_operand.vmem [shape: f32[1,16], index: 2, kind: input, shape index: {}]   ;;  %s1847_s3 = inlined_call_operand.vmem [shape: f32[1,16], index: 3, kind: input, shape index: {}]   ;;  %s1848_s4 = inlined_call_operand.vmem [shape: f32[512,16], index: 4, kind: output, shape index: {}]  }
   0x1   :  { %v81_v0 = vld [vmem:[%s1844_s1] sm:$0xff]  ;;  %v18_v3 = vld [vmem:[%s1845_s0 + $0x8] sm:$0xff]  ;;  %v19_v5 = vld [vmem:[%s1845_s0 + $0x10] sm:$0xff] }
   0x2   :  { %v17_v1 = vld [vmem:[%s1845_s0] sm:$0xff]  ;;  %1066 = vmatprep.subr.mxu0 %v81_v0  ;;  %1164 = vmatprep.subr.mxu1 %v81_v0  ;;  %v50_v4 = vld [vmem:[%s1845_s0 + $0x108] sm:$0xff]  ;;  %v51_v6 = vld [vmem:[%s1845_s0 + $0x110] sm:$0xff] }
   0x3   :  { %v49_v2 = vld [vmem:[%s1845_s0 + $0x100] sm:$0xff]  ;;  %1067 = vmatpush3.msra.mxu0 %v81_v0  ;;  %1165 = vmatpush3.msra.mxu1 %v81_v0  ;;  %v20_v7 = vld [vmem:[%s1845_s0 + $0x18] sm:$0xff]  ;;  %v22_v11 = vld [vmem:[%s1845_s0 + $0x28] sm:$0xff] }
   0x4   :  { %1068 = vmatprep.mubr.msk.f32.mxu0 %vm82_vm0, %v17_v1  ;;  %1116 = vmatprep.mubr.msk.f32.mxu1 %vm82_vm0, %v49_v2  ;;  %v52_v8 = vld [vmem:[%s1845_s0 + $0x118] sm:$0xff]  ;;  %v21_v9 = vld [vmem:[%s1845_s0 + $0x20] sm:$0xff]  ;;  %v54_v12 = vld [vmem:[%s1845_s0 + $0x128] sm:$0xff] }
   0x5   :  { %1069 = vmatmul.mubr.msk.f32.vlgmr.msra.gmra.mrb[0].mxu0 %vm82_vm0, %v18_v3  ;;  %1117 = vmatmul.mubr.msk.f32.vlgmr.msra.gmra.mrb[0].mxu1 %vm82_vm0, %v50_v4  ;;  %v53_v10 = vld [vmem:[%s1845_s0 + $0x120] sm:$0xff]  ;;  %v23_v13 = vld [vmem:[%s1845_s0 + $0x30] sm:$0xff]  ;;  %v24_v15 = vld [vmem:[%s1845_s0 + $0x38] sm:$0xff] }
   0x6   :  { %1071 = vmatprep.mubr.msk.f32.mxu0 %vm82_vm0, %v19_v5  ;;  %1119 = vmatprep.mubr.msk.f32.mxu1 %vm82_vm0, %v51_v6  ;;  %v55_v14 = vld [vmem:[%s1845_s0 + $0x130] sm:$0xff]  ;;  %v56_v16 = vld [vmem:[%s1845_s0 + $0x138] sm:$0xff]  ;;  %v25_v17 = vld [vmem:[%s1845_s0 + $0x40] sm:$0xff] }
   0x7   :  { %v57_v18 = vld [vmem:[%s1845_s0 + $0x140] sm:$0xff]  ;;  %v26_v19 = vld [vmem:[%s1845_s0 + $0x48] sm:$0xff]  ;;  %v27_v21 = vld [vmem:[%s1845_s0 + $0x50] sm:$0xff] }
   0x8   :  { %v58_v20 = vld [vmem:[%s1845_s0 + $0x148] sm:$0xff]  ;;  %v59_v22 = vld [vmem:[%s1845_s0 + $0x150] sm:$0xff]  ;;  %v28_v23 = vld [vmem:[%s1845_s0 + $0x58] sm:$0xff] }
   0x9   :  { %1072 = vmatmul.mubr.msk.f32.gmra.mrb[2].mxu0 %vm82_vm0, %v20_v7  ;;  %1120 = vmatmul.mubr.msk.f32.gmra.mrb[2].mxu1 %vm82_vm0, %v52_v8  ;;  %v60_v24 = vld [vmem:[%s1845_s0 + $0x158] sm:$0xff]  ;;  %v29_v25 = vld [vmem:[%s1845_s0 + $0x60] sm:$0xff]  ;;  %v30_v27 = vld [vmem:[%s1845_s0 + $0x68] sm:$0xff] }
   0xa   :  { %1074 = vmatprep.mubr.msk.f32.mxu0 %vm82_vm0, %v21_v9  ;;  %1122 = vmatprep.mubr.msk.f32.mxu1 %vm82_vm0, %v53_v10  ;;  %v61_v26 = vld [vmem:[%s1845_s0 + $0x160] sm:$0xff]  ;;  %v62_v28 = vld [vmem:[%s1845_s0 + $0x168] sm:$0xff]  ;;  %v31_v29 = vld [vmem:[%s1845_s0 + $0x70] sm:$0xff] }
   0xb   :  { %v63_v30 = vld [vmem:[%s1845_s0 + $0x170] sm:$0xff]  ;;  %v32_v31 = vld [vmem:[%s1845_s0 + $0x78] sm:$0xff]  ;;  %v33_v33 = vld [vmem:[%s1845_s0 + $0x80] sm:$0xff] }
   0xc   :  { %v64_v32 = vld [vmem:[%s1845_s0 + $0x178] sm:$0xff]  ;;  %v65_v34 = vld [vmem:[%s1845_s0 + $0x180] sm:$0xff]  ;;  %v34_v35 = vld [vmem:[%s1845_s0 + $0x88] sm:$0xff] }
   0xd   :  { %1075 = vmatmul.mubr.msk.f32.gmra.mrb[4].mxu0 %vm82_vm0, %v22_v11  ;;  %1123 = vmatmul.mubr.msk.f32.gmra.mrb[4].mxu1 %vm82_vm0, %v54_v12  ;;  %v66_v36 = vld [vmem:[%s1845_s0 + $0x188] sm:$0xff]  ;;  %v35_v37 = vld [vmem:[%s1845_s0 + $0x90] sm:$0xff]  ;;  %v36_v39 = vld [vmem:[%s1845_s0 + $0x98] sm:$0xff] }
   0xe   :  { %1077 = vmatprep.mubr.msk.f32.mxu0 %vm82_vm0, %v23_v13  ;;  %1125 = vmatprep.mubr.msk.f32.mxu1 %vm82_vm0, %v55_v14  ;;  %v67_v38 = vld [vmem:[%s1845_s0 + $0x190] sm:$0xff]  ;;  %v68_v40 = vld [vmem:[%s1845_s0 + $0x198] sm:$0xff]  ;;  %v37_v41 = vld [vmem:[%s1845_s0 + $0xa0] sm:$0xff] }
   0xf   :  { %v69_v42 = vld [vmem:[%s1845_s0 + $0x1a0] sm:$0xff]  ;;  %v38_v43 = vld [vmem:[%s1845_s0 + $0xa8] sm:$0xff]  ;;  %v39_v45 = vld [vmem:[%s1845_s0 + $0xb0] sm:$0xff] }
  0x10   :  { %v70_v44 = vld [vmem:[%s1845_s0 + $0x1a8] sm:$0xff]  ;;  %v71_v46 = vld [vmem:[%s1845_s0 + $0x1b0] sm:$0xff]  ;;  %v40_v47 = vld [vmem:[%s1845_s0 + $0xb8] sm:$0xff] }
  0x11   :  { %1078 = vmatmul.mubr.msk.f32.gmra.mrb[6].mxu0 %vm82_vm0, %v24_v15  ;;  %1126 = vmatmul.mubr.msk.f32.gmra.mrb[6].mxu1 %vm82_vm0, %v56_v16  ;;  %v72_v48 = vld [vmem:[%s1845_s0 + $0x1b8] sm:$0xff]  ;;  %v41_v49 = vld [vmem:[%s1845_s0 + $0xc0] sm:$0xff]  ;;  %v42_v51 = vld [vmem:[%s1845_s0 + $0xc8] sm:$0xff] }
  0x12   :  { %1080 = vmatprep.mubr.msk.f32.mxu0 %vm82_vm0, %v25_v17  ;;  %1128 = vmatprep.mubr.msk.f32.mxu1 %vm82_vm0, %v57_v18  ;;  %v73_v50 = vld [vmem:[%s1845_s0 + $0x1c0] sm:$0xff]  ;;  %v74_v52 = vld [vmem:[%s1845_s0 + $0x1c8] sm:$0xff]  ;;  %v43_v53 = vld [vmem:[%s1845_s0 + $0xd0] sm:$0xff] }
  0x13   :  { %v75_v54 = vld [vmem:[%s1845_s0 + $0x1d0] sm:$0xff]  ;;  %v44_v55 = vld [vmem:[%s1845_s0 + $0xd8] sm:$0xff]  ;;  %v45_v57 = vld [vmem:[%s1845_s0 + $0xe0] sm:$0xff] }
  0x14   :  { %v76_v56 = vld [vmem:[%s1845_s0 + $0x1d8] sm:$0xff]  ;;  %v77_v58 = vld [vmem:[%s1845_s0 + $0x1e0] sm:$0xff]  ;;  %v46_v59 = vld [vmem:[%s1845_s0 + $0xe8] sm:$0xff] }
  0x15   :  { %1081 = vmatmul.mubr.msk.f32.gmra.mrb[8].mxu0 %vm82_vm0, %v26_v19  ;;  %1129 = vmatmul.mubr.msk.f32.gmra.mrb[8].mxu1 %vm82_vm0, %v58_v20  ;;  %v78_v60 = vld [vmem:[%s1845_s0 + $0x1e8] sm:$0xff]  ;;  %v47_v61 = vld [vmem:[%s1845_s0 + $0xf0] sm:$0xff]  ;;  %v48_v63 = vld [vmem:[%s1845_s0 + $0xf8] sm:$0xff] }
  0x16   :  { %1083 = vmatprep.mubr.msk.f32.mxu0 %vm82_vm0, %v27_v21  ;;  %1131 = vmatprep.mubr.msk.f32.mxu1 %vm82_vm0, %v59_v22  ;;  %v79_v62 = vld [vmem:[%s1845_s0 + $0x1f0] sm:$0xff]  ;;  %v80_v0 = vld [vmem:[%s1845_s0 + $0x1f8] sm:$0xff]  ;;  %v1453_v1 = vld [vmem:[%s1846_s2] ss:$0 sm:$0xff] }
  0x17   :  { %v1458_v3 = vld [vmem:[%s1847_s3] ss:$0 sm:$0xff] }
  0x19   :  { %1084 = vmatmul.mubr.msk.f32.gmra.mrb[10].mxu0 %vm82_vm0, %v28_v23  ;;  %1132 = vmatmul.mubr.msk.f32.gmra.mrb[10].mxu1 %vm82_vm0, %v60_v24 }
  0x1a   :  { %1086 = vmatprep.mubr.msk.f32.mxu0 %vm82_vm0, %v29_v25  ;;  %1134 = vmatprep.mubr.msk.f32.mxu1 %vm82_vm0, %v61_v26 }
  0x1d   :  { %1087 = vmatmul.mubr.msk.f32.gmra.mrb[12].mxu0 %vm82_vm0, %v30_v27  ;;  %1135 = vmatmul.mubr.msk.f32.gmra.mrb[12].mxu1 %vm82_vm0, %v62_v28 }
  0x1e   :  { %1089 = vmatprep.mubr.msk.f32.mxu0 %vm82_vm0, %v31_v29  ;;  %1137 = vmatprep.mubr.msk.f32.mxu1 %vm82_vm0, %v63_v30 }
  0x21   :  { %1090 = vmatmul.mubr.msk.f32.gmra.mrb[14].mxu0 %vm82_vm0, %v32_v31  ;;  %1138 = vmatmul.mubr.msk.f32.gmra.mrb[14].mxu1 %vm82_vm0, %v64_v32 }
  0x22   :  { %1092 = vmatprep.mubr.msk.f32.mxu0 %vm82_vm0, %v33_v33  ;;  %1140 = vmatprep.mubr.msk.f32.mxu1 %vm82_vm0, %v65_v34 }
  0x25   :  { %1093 = vmatmul.mubr.msk.f32.gmra.mrb[16].mxu0 %vm82_vm0, %v34_v35  ;;  %1141 = vmatmul.mubr.msk.f32.gmra.mrb[16].mxu1 %vm82_vm0, %v66_v36 }
  0x26   :  { %1095 = vmatprep.mubr.msk.f32.mxu0 %vm82_vm0, %v35_v37  ;;  %1143 = vmatprep.mubr.msk.f32.mxu1 %vm82_vm0, %v67_v38 }
  0x29   :  { %1096 = vmatmul.mubr.msk.f32.gmra.mrb[18].mxu0 %vm82_vm0, %v36_v39  ;;  %1144 = vmatmul.mubr.msk.f32.gmra.mrb[18].mxu1 %vm82_vm0, %v68_v40 }
  0x2a   :  { %1098 = vmatprep.mubr.msk.f32.mxu0 %vm82_vm0, %v37_v41  ;;  %1146 = vmatprep.mubr.msk.f32.mxu1 %vm82_vm0, %v69_v42 }
  0x2d   :  { %1099 = vmatmul.mubr.msk.f32.gmra.mrb[20].mxu0 %vm82_vm0, %v38_v43  ;;  %1147 = vmatmul.mubr.msk.f32.gmra.mrb[20].mxu1 %vm82_vm0, %v70_v44 }
  0x2e   :  { %1101 = vmatprep.mubr.msk.f32.mxu0 %vm82_vm0, %v39_v45  ;;  %1149 = vmatprep.mubr.msk.f32.mxu1 %vm82_vm0, %v71_v46 }
  0x31   :  { %1102 = vmatmul.mubr.msk.f32.gmra.mrb[22].mxu0 %vm82_vm0, %v40_v47  ;;  %1150 = vmatmul.mubr.msk.f32.gmra.mrb[22].mxu1 %vm82_vm0, %v72_v48 }
  0x32   :  { %1104 = vmatprep.mubr.msk.f32.mxu0 %vm82_vm0, %v41_v49  ;;  %1152 = vmatprep.mubr.msk.f32.mxu1 %vm82_vm0, %v73_v50 }
  0x35   :  { %1105 = vmatmul.mubr.msk.f32.gmra.mrb[24].mxu0 %vm82_vm0, %v42_v51  ;;  %1153 = vmatmul.mubr.msk.f32.gmra.mrb[24].mxu1 %vm82_vm0, %v74_v52 }
  0x36   :  { %1107 = vmatprep.mubr.msk.f32.mxu0 %vm82_vm0, %v43_v53  ;;  %1155 = vmatprep.mubr.msk.f32.mxu1 %vm82_vm0, %v75_v54 }
  0x39   :  { %1108 = vmatmul.mubr.msk.f32.gmra.mrb[26].mxu0 %vm82_vm0, %v44_v55  ;;  %1156 = vmatmul.mubr.msk.f32.gmra.mrb[26].mxu1 %vm82_vm0, %v76_v56 }
  0x3a   :  { %1110 = vmatprep.mubr.msk.f32.mxu0 %vm82_vm0, %v45_v57  ;;  %1158 = vmatprep.mubr.msk.f32.mxu1 %vm82_vm0, %v77_v58 }
  0x3d   :  { %1111 = vmatmul.mubr.msk.f32.gmra.mrb[28].mxu0 %vm82_vm0, %v46_v59  ;;  %1159 = vmatmul.mubr.msk.f32.gmra.mrb[28].mxu1 %vm82_vm0, %v78_v60 }
  0x3e   :  { %1113 = vmatprep.mubr.msk.f32.mxu0 %vm82_vm0, %v47_v61  ;;  %1161 = vmatprep.mubr.msk.f32.mxu1 %vm82_vm0, %v79_v62 }
  0x41   :  { %1114 = vmatmul.mubr.msk.f32.gmra.mrb[30].mxu0 %vm82_vm0, %v48_v63  ;;  %1162 = vmatmul.mubr.msk.f32.gmra.mrb[30].mxu1 %vm82_vm0, %v80_v0 }
  0xd8   :  { %v1070_v2 = vpop.f32.mrb[0].mxu0  ;;  %v1118_v4 = vpop.f32.mrb[0].mxu1 }
  0xd9   :  { %v668_v5 = vmul.f32 %v1070_v2, %v1453_v1  ;;  %v700_v6 = vmul.f32 %v1118_v4, %v1453_v1  ;;  %v341_v7 = vpop.f32.mrb[1].mxu0  ;;  %v501_v8 = vpop.f32.mrb[1].mxu1 }
  0xda   :  { %v667_v9 = vmul.f32 %v1453_v1, %v341_v7  ;;  %v699_v10 = vmul.f32 %v1453_v1, %v501_v8 }
  0xdb   :  { %v739_v11 = vadd.f32 %v1458_v3, %v668_v5  ;;  %v771_v12 = vadd.f32 %v1458_v3, %v700_v6 }
  0xdc   :  { %v738_v13 = vadd.f32 %v1458_v3, %v667_v9  ;;  %v770_v14 = vadd.f32 %v1458_v3, %v699_v10  ;;  %v1073_v15 = vpop.f32.mrb[2].mxu0  ;;  %v1121_v16 = vpop.f32.mrb[2].mxu1 }
  0xdd   :  { %v803_v17 = vmax.f32 %v739_v11, 0.0  ;;  %v835_v18 = vmax.f32 %v771_v12, 0.0  ;;  %v670_v19 = vmul.f32 %v1073_v15, %v1453_v1  ;;  %v702_v20 = vmul.f32 %v1121_v16, %v1453_v1  ;;  %v351_v21 = vpop.f32.mrb[3].mxu0  ;;  %v511_v22 = vpop.f32.mrb[3].mxu1 }
  0xde   :  { %v802_v23 = vmax.f32 %v738_v13, 0.0  ;;  %v834_v24 = vmax.f32 %v770_v14, 0.0  ;;  %v669_v25 = vmul.f32 %v1453_v1, %v351_v21  ;;  %v701_v26 = vmul.f32 %v1453_v1, %v511_v22 }
  0xdf   :  { %868 = vst.msk [vmem:[%s1848_s4 + $0x8] sm:$0xff] %vm866_vm1, %v803_v17  ;;  %900 = vst.msk [vmem:[%s1848_s4 + $0x108] sm:$0xff] %vm866_vm1, %v835_v18  ;;  %v741_v27 = vadd.f32 %v1458_v3, %v670_v19  ;;  %v773_v28 = vadd.f32 %v1458_v3, %v702_v20 }
  0xe0   :  { %867 = vst.msk [vmem:[%s1848_s4] sm:$0xff] %vm866_vm1, %v802_v23  ;;  %899 = vst.msk [vmem:[%s1848_s4 + $0x100] sm:$0xff] %vm866_vm1, %v834_v24  ;;  %v740_v29 = vadd.f32 %v1458_v3, %v669_v25  ;;  %v772_v30 = vadd.f32 %v1458_v3, %v701_v26  ;;  %v1076_v31 = vpop.f32.mrb[4].mxu0  ;;  %v1124_v32 = vpop.f32.mrb[4].mxu1 }
  0xe1   :  { %v805_v33 = vmax.f32 %v741_v27, 0.0  ;;  %v837_v34 = vmax.f32 %v773_v28, 0.0  ;;  %v672_v35 = vmul.f32 %v1076_v31, %v1453_v1  ;;  %v704_v36 = vmul.f32 %v1124_v32, %v1453_v1  ;;  %v361_v37 = vpop.f32.mrb[5].mxu0  ;;  %v521_v38 = vpop.f32.mrb[5].mxu1 }
  0xe2   :  { %v804_v39 = vmax.f32 %v740_v29, 0.0  ;;  %v836_v40 = vmax.f32 %v772_v30, 0.0  ;;  %v671_v41 = vmul.f32 %v1453_v1, %v361_v37  ;;  %v703_v42 = vmul.f32 %v1453_v1, %v521_v38 }
  0xe3   :  { %870 = vst.msk [vmem:[%s1848_s4 + $0x18] sm:$0xff] %vm866_vm1, %v805_v33  ;;  %902 = vst.msk [vmem:[%s1848_s4 + $0x118] sm:$0xff] %vm866_vm1, %v837_v34  ;;  %v743_v43 = vadd.f32 %v1458_v3, %v672_v35  ;;  %v775_v44 = vadd.f32 %v1458_v3, %v704_v36 }
  0xe4   :  { %869 = vst.msk [vmem:[%s1848_s4 + $0x10] sm:$0xff] %vm866_vm1, %v804_v39  ;;  %901 = vst.msk [vmem:[%s1848_s4 + $0x110] sm:$0xff] %vm866_vm1, %v836_v40  ;;  %v742_v45 = vadd.f32 %v1458_v3, %v671_v41  ;;  %v774_v46 = vadd.f32 %v1458_v3, %v703_v42  ;;  %v1079_v47 = vpop.f32.mrb[6].mxu0  ;;  %v1127_v48 = vpop.f32.mrb[6].mxu1 }
  0xe5   :  { %v807_v49 = vmax.f32 %v743_v43, 0.0  ;;  %v839_v50 = vmax.f32 %v775_v44, 0.0  ;;  %v674_v51 = vmul.f32 %v1079_v47, %v1453_v1  ;;  %v706_v52 = vmul.f32 %v1127_v48, %v1453_v1  ;;  %v371_v53 = vpop.f32.mrb[7].mxu0  ;;  %v531_v54 = vpop.f32.mrb[7].mxu1 }
  0xe6   :  { %v806_v55 = vmax.f32 %v742_v45, 0.0  ;;  %v838_v56 = vmax.f32 %v774_v46, 0.0  ;;  %v673_v57 = vmul.f32 %v1453_v1, %v371_v53  ;;  %v705_v58 = vmul.f32 %v1453_v1, %v531_v54 }
  0xe7   :  { %872 = vst.msk [vmem:[%s1848_s4 + $0x28] sm:$0xff] %vm866_vm1, %v807_v49  ;;  %904 = vst.msk [vmem:[%s1848_s4 + $0x128] sm:$0xff] %vm866_vm1, %v839_v50  ;;  %v745_v59 = vadd.f32 %v1458_v3, %v674_v51  ;;  %v777_v60 = vadd.f32 %v1458_v3, %v706_v52 }
  0xe8   :  { %871 = vst.msk [vmem:[%s1848_s4 + $0x20] sm:$0xff] %vm866_vm1, %v806_v55  ;;  %903 = vst.msk [vmem:[%s1848_s4 + $0x120] sm:$0xff] %vm866_vm1, %v838_v56  ;;  %v744_v61 = vadd.f32 %v1458_v3, %v673_v57  ;;  %v776_v62 = vadd.f32 %v1458_v3, %v705_v58  ;;  %v1082_v63 = vpop.f32.mrb[8].mxu0  ;;  %v1130_v0 = vpop.f32.mrb[8].mxu1 }
  0xe9   :  { %v809_v2 = vmax.f32 %v745_v59, 0.0  ;;  %v841_v4 = vmax.f32 %v777_v60, 0.0  ;;  %v676_v5 = vmul.f32 %v1082_v63, %v1453_v1  ;;  %v708_v6 = vmul.f32 %v1130_v0, %v1453_v1  ;;  %v381_v7 = vpop.f32.mrb[9].mxu0  ;;  %v541_v8 = vpop.f32.mrb[9].mxu1 }
  0xea   :  { %v808_v9 = vmax.f32 %v744_v61, 0.0  ;;  %v840_v10 = vmax.f32 %v776_v62, 0.0  ;;  %v675_v11 = vmul.f32 %v1453_v1, %v381_v7  ;;  %v707_v12 = vmul.f32 %v1453_v1, %v541_v8 }
  0xeb   :  { %874 = vst.msk [vmem:[%s1848_s4 + $0x38] sm:$0xff] %vm866_vm1, %v809_v2  ;;  %906 = vst.msk [vmem:[%s1848_s4 + $0x138] sm:$0xff] %vm866_vm1, %v841_v4  ;;  %v747_v13 = vadd.f32 %v1458_v3, %v676_v5  ;;  %v779_v14 = vadd.f32 %v1458_v3, %v708_v6 }
  0xec   :  { %873 = vst.msk [vmem:[%s1848_s4 + $0x30] sm:$0xff] %vm866_vm1, %v808_v9  ;;  %905 = vst.msk [vmem:[%s1848_s4 + $0x130] sm:$0xff] %vm866_vm1, %v840_v10  ;;  %v746_v15 = vadd.f32 %v1458_v3, %v675_v11  ;;  %v778_v16 = vadd.f32 %v1458_v3, %v707_v12  ;;  %v1085_v17 = vpop.f32.mrb[10].mxu0  ;;  %v1133_v18 = vpop.f32.mrb[10].mxu1 }
  0xed   :  { %v811_v19 = vmax.f32 %v747_v13, 0.0  ;;  %v843_v20 = vmax.f32 %v779_v14, 0.0  ;;  %v678_v21 = vmul.f32 %v1085_v17, %v1453_v1  ;;  %v710_v22 = vmul.f32 %v1133_v18, %v1453_v1  ;;  %v391_v23 = vpop.f32.mrb[11].mxu0  ;;  %v551_v24 = vpop.f32.mrb[11].mxu1 }
  0xee   :  { %v810_v25 = vmax.f32 %v746_v15, 0.0  ;;  %v842_v26 = vmax.f32 %v778_v16, 0.0  ;;  %v677_v27 = vmul.f32 %v1453_v1, %v391_v23  ;;  %v709_v28 = vmul.f32 %v1453_v1, %v551_v24 }
  0xef   :  { %876 = vst.msk [vmem:[%s1848_s4 + $0x48] sm:$0xff] %vm866_vm1, %v811_v19  ;;  %908 = vst.msk [vmem:[%s1848_s4 + $0x148] sm:$0xff] %vm866_vm1, %v843_v20  ;;  %v749_v29 = vadd.f32 %v1458_v3, %v678_v21  ;;  %v781_v30 = vadd.f32 %v1458_v3, %v710_v22 }
  0xf0   :  { %875 = vst.msk [vmem:[%s1848_s4 + $0x40] sm:$0xff] %vm866_vm1, %v810_v25  ;;  %907 = vst.msk [vmem:[%s1848_s4 + $0x140] sm:$0xff] %vm866_vm1, %v842_v26  ;;  %v748_v31 = vadd.f32 %v1458_v3, %v677_v27  ;;  %v780_v32 = vadd.f32 %v1458_v3, %v709_v28  ;;  %v1088_v33 = vpop.f32.mrb[12].mxu0  ;;  %v1136_v34 = vpop.f32.mrb[12].mxu1 }
  0xf1   :  { %v813_v35 = vmax.f32 %v749_v29, 0.0  ;;  %v845_v36 = vmax.f32 %v781_v30, 0.0  ;;  %v680_v37 = vmul.f32 %v1088_v33, %v1453_v1  ;;  %v712_v38 = vmul.f32 %v1136_v34, %v1453_v1  ;;  %v401_v39 = vpop.f32.mrb[13].mxu0  ;;  %v561_v40 = vpop.f32.mrb[13].mxu1 }
  0xf2   :  { %v812_v41 = vmax.f32 %v748_v31, 0.0  ;;  %v844_v42 = vmax.f32 %v780_v32, 0.0  ;;  %v679_v43 = vmul.f32 %v1453_v1, %v401_v39  ;;  %v711_v44 = vmul.f32 %v1453_v1, %v561_v40 }
  0xf3   :  { %878 = vst.msk [vmem:[%s1848_s4 + $0x58] sm:$0xff] %vm866_vm1, %v813_v35  ;;  %910 = vst.msk [vmem:[%s1848_s4 + $0x158] sm:$0xff] %vm866_vm1, %v845_v36  ;;  %v751_v45 = vadd.f32 %v1458_v3, %v680_v37  ;;  %v783_v46 = vadd.f32 %v1458_v3, %v712_v38 }
  0xf4   :  { %877 = vst.msk [vmem:[%s1848_s4 + $0x50] sm:$0xff] %vm866_vm1, %v812_v41  ;;  %909 = vst.msk [vmem:[%s1848_s4 + $0x150] sm:$0xff] %vm866_vm1, %v844_v42  ;;  %v750_v47 = vadd.f32 %v1458_v3, %v679_v43  ;;  %v782_v48 = vadd.f32 %v1458_v3, %v711_v44  ;;  %v1091_v49 = vpop.f32.mrb[14].mxu0  ;;  %v1139_v50 = vpop.f32.mrb[14].mxu1 }
  0xf5   :  { %v815_v51 = vmax.f32 %v751_v45, 0.0  ;;  %v847_v52 = vmax.f32 %v783_v46, 0.0  ;;  %v682_v53 = vmul.f32 %v1091_v49, %v1453_v1  ;;  %v714_v54 = vmul.f32 %v1139_v50, %v1453_v1  ;;  %v411_v55 = vpop.f32.mrb[15].mxu0  ;;  %v571_v56 = vpop.f32.mrb[15].mxu1 }
  0xf6   :  { %v814_v57 = vmax.f32 %v750_v47, 0.0  ;;  %v846_v58 = vmax.f32 %v782_v48, 0.0  ;;  %v681_v59 = vmul.f32 %v1453_v1, %v411_v55  ;;  %v713_v60 = vmul.f32 %v1453_v1, %v571_v56 }
  0xf7   :  { %880 = vst.msk [vmem:[%s1848_s4 + $0x68] sm:$0xff] %vm866_vm1, %v815_v51  ;;  %912 = vst.msk [vmem:[%s1848_s4 + $0x168] sm:$0xff] %vm866_vm1, %v847_v52  ;;  %v753_v61 = vadd.f32 %v1458_v3, %v682_v53  ;;  %v785_v62 = vadd.f32 %v1458_v3, %v714_v54 }
  0xf8   :  { %879 = vst.msk [vmem:[%s1848_s4 + $0x60] sm:$0xff] %vm866_vm1, %v814_v57  ;;  %911 = vst.msk [vmem:[%s1848_s4 + $0x160] sm:$0xff] %vm866_vm1, %v846_v58  ;;  %v752_v63 = vadd.f32 %v1458_v3, %v681_v59  ;;  %v784_v0 = vadd.f32 %v1458_v3, %v713_v60  ;;  %v1094_v2 = vpop.f32.mrb[16].mxu0  ;;  %v1142_v4 = vpop.f32.mrb[16].mxu1 }
  0xf9   :  { %v817_v5 = vmax.f32 %v753_v61, 0.0  ;;  %v849_v6 = vmax.f32 %v785_v62, 0.0  ;;  %v684_v7 = vmul.f32 %v1094_v2, %v1453_v1  ;;  %v716_v8 = vmul.f32 %v1142_v4, %v1453_v1  ;;  %v421_v9 = vpop.f32.mrb[17].mxu0  ;;  %v581_v10 = vpop.f32.mrb[17].mxu1 }
  0xfa   :  { %v816_v11 = vmax.f32 %v752_v63, 0.0  ;;  %v848_v12 = vmax.f32 %v784_v0, 0.0  ;;  %v683_v13 = vmul.f32 %v1453_v1, %v421_v9  ;;  %v715_v14 = vmul.f32 %v1453_v1, %v581_v10 }
  0xfb   :  { %882 = vst.msk [vmem:[%s1848_s4 + $0x78] sm:$0xff] %vm866_vm1, %v817_v5  ;;  %914 = vst.msk [vmem:[%s1848_s4 + $0x178] sm:$0xff] %vm866_vm1, %v849_v6  ;;  %v755_v15 = vadd.f32 %v1458_v3, %v684_v7  ;;  %v787_v16 = vadd.f32 %v1458_v3, %v716_v8 }
  0xfc   :  { %881 = vst.msk [vmem:[%s1848_s4 + $0x70] sm:$0xff] %vm866_vm1, %v816_v11  ;;  %913 = vst.msk [vmem:[%s1848_s4 + $0x170] sm:$0xff] %vm866_vm1, %v848_v12  ;;  %v754_v17 = vadd.f32 %v1458_v3, %v683_v13  ;;  %v786_v18 = vadd.f32 %v1458_v3, %v715_v14  ;;  %v1097_v19 = vpop.f32.mrb[18].mxu0  ;;  %v1145_v20 = vpop.f32.mrb[18].mxu1 }
  0xfd   :  { %v819_v21 = vmax.f32 %v755_v15, 0.0  ;;  %v851_v22 = vmax.f32 %v787_v16, 0.0  ;;  %v686_v23 = vmul.f32 %v1097_v19, %v1453_v1  ;;  %v718_v24 = vmul.f32 %v1145_v20, %v1453_v1  ;;  %v431_v25 = vpop.f32.mrb[19].mxu0  ;;  %v591_v26 = vpop.f32.mrb[19].mxu1 }
  0xfe   :  { %v818_v27 = vmax.f32 %v754_v17, 0.0  ;;  %v850_v28 = vmax.f32 %v786_v18, 0.0  ;;  %v685_v29 = vmul.f32 %v1453_v1, %v431_v25  ;;  %v717_v30 = vmul.f32 %v1453_v1, %v591_v26 }
  0xff   :  { %884 = vst.msk [vmem:[%s1848_s4 + $0x88] sm:$0xff] %vm866_vm1, %v819_v21  ;;  %916 = vst.msk [vmem:[%s1848_s4 + $0x188] sm:$0xff] %vm866_vm1, %v851_v22  ;;  %v757_v31 = vadd.f32 %v1458_v3, %v686_v23  ;;  %v789_v32 = vadd.f32 %v1458_v3, %v718_v24 }
 0x100   :  { %883 = vst.msk [vmem:[%s1848_s4 + $0x80] sm:$0xff] %vm866_vm1, %v818_v27  ;;  %915 = vst.msk [vmem:[%s1848_s4 + $0x180] sm:$0xff] %vm866_vm1, %v850_v28  ;;  %v756_v33 = vadd.f32 %v1458_v3, %v685_v29  ;;  %v788_v34 = vadd.f32 %v1458_v3, %v717_v30  ;;  %v1100_v35 = vpop.f32.mrb[20].mxu0  ;;  %v1148_v36 = vpop.f32.mrb[20].mxu1 }
 0x101   :  { %v821_v37 = vmax.f32 %v757_v31, 0.0  ;;  %v853_v38 = vmax.f32 %v789_v32, 0.0  ;;  %v688_v39 = vmul.f32 %v1100_v35, %v1453_v1  ;;  %v720_v40 = vmul.f32 %v1148_v36, %v1453_v1  ;;  %v441_v41 = vpop.f32.mrb[21].mxu0  ;;  %v601_v42 = vpop.f32.mrb[21].mxu1 }
 0x102   :  { %v820_v43 = vmax.f32 %v756_v33, 0.0  ;;  %v852_v44 = vmax.f32 %v788_v34, 0.0  ;;  %v687_v45 = vmul.f32 %v1453_v1, %v441_v41  ;;  %v719_v46 = vmul.f32 %v1453_v1, %v601_v42 }
 0x103   :  { %886 = vst.msk [vmem:[%s1848_s4 + $0x98] sm:$0xff] %vm866_vm1, %v821_v37  ;;  %918 = vst.msk [vmem:[%s1848_s4 + $0x198] sm:$0xff] %vm866_vm1, %v853_v38  ;;  %v759_v47 = vadd.f32 %v1458_v3, %v688_v39  ;;  %v791_v48 = vadd.f32 %v1458_v3, %v720_v40 }
 0x104   :  { %885 = vst.msk [vmem:[%s1848_s4 + $0x90] sm:$0xff] %vm866_vm1, %v820_v43  ;;  %917 = vst.msk [vmem:[%s1848_s4 + $0x190] sm:$0xff] %vm866_vm1, %v852_v44  ;;  %v758_v49 = vadd.f32 %v1458_v3, %v687_v45  ;;  %v790_v50 = vadd.f32 %v1458_v3, %v719_v46  ;;  %v1103_v51 = vpop.f32.mrb[22].mxu0  ;;  %v1151_v52 = vpop.f32.mrb[22].mxu1 }
 0x105   :  { %v823_v53 = vmax.f32 %v759_v47, 0.0  ;;  %v855_v54 = vmax.f32 %v791_v48, 0.0  ;;  %v690_v55 = vmul.f32 %v1103_v51, %v1453_v1  ;;  %v722_v56 = vmul.f32 %v1151_v52, %v1453_v1  ;;  %v451_v57 = vpop.f32.mrb[23].mxu0  ;;  %v611_v58 = vpop.f32.mrb[23].mxu1 }
 0x106   :  { %v822_v59 = vmax.f32 %v758_v49, 0.0  ;;  %v854_v60 = vmax.f32 %v790_v50, 0.0  ;;  %v689_v61 = vmul.f32 %v1453_v1, %v451_v57  ;;  %v721_v62 = vmul.f32 %v1453_v1, %v611_v58 }
 0x107   :  { %888 = vst.msk [vmem:[%s1848_s4 + $0xa8] sm:$0xff] %vm866_vm1, %v823_v53  ;;  %920 = vst.msk [vmem:[%s1848_s4 + $0x1a8] sm:$0xff] %vm866_vm1, %v855_v54  ;;  %v761_v63 = vadd.f32 %v1458_v3, %v690_v55  ;;  %v793_v0 = vadd.f32 %v1458_v3, %v722_v56 }
 0x108   :  { %887 = vst.msk [vmem:[%s1848_s4 + $0xa0] sm:$0xff] %vm866_vm1, %v822_v59  ;;  %919 = vst.msk [vmem:[%s1848_s4 + $0x1a0] sm:$0xff] %vm866_vm1, %v854_v60  ;;  %v760_v2 = vadd.f32 %v1458_v3, %v689_v61  ;;  %v792_v4 = vadd.f32 %v1458_v3, %v721_v62  ;;  %v1106_v5 = vpop.f32.mrb[24].mxu0  ;;  %v1154_v6 = vpop.f32.mrb[24].mxu1 }
 0x109   :  { %v825_v7 = vmax.f32 %v761_v63, 0.0  ;;  %v857_v8 = vmax.f32 %v793_v0, 0.0  ;;  %v692_v9 = vmul.f32 %v1106_v5, %v1453_v1  ;;  %v724_v10 = vmul.f32 %v1154_v6, %v1453_v1  ;;  %v461_v11 = vpop.f32.mrb[25].mxu0  ;;  %v621_v12 = vpop.f32.mrb[25].mxu1 }
 0x10a   :  { %v824_v13 = vmax.f32 %v760_v2, 0.0  ;;  %v856_v14 = vmax.f32 %v792_v4, 0.0  ;;  %v691_v15 = vmul.f32 %v1453_v1, %v461_v11  ;;  %v723_v16 = vmul.f32 %v1453_v1, %v621_v12 }
 0x10b   :  { %890 = vst.msk [vmem:[%s1848_s4 + $0xb8] sm:$0xff] %vm866_vm1, %v825_v7  ;;  %922 = vst.msk [vmem:[%s1848_s4 + $0x1b8] sm:$0xff] %vm866_vm1, %v857_v8  ;;  %v763_v17 = vadd.f32 %v1458_v3, %v692_v9  ;;  %v795_v18 = vadd.f32 %v1458_v3, %v724_v10 }
 0x10c   :  { %889 = vst.msk [vmem:[%s1848_s4 + $0xb0] sm:$0xff] %vm866_vm1, %v824_v13  ;;  %921 = vst.msk [vmem:[%s1848_s4 + $0x1b0] sm:$0xff] %vm866_vm1, %v856_v14  ;;  %v762_v19 = vadd.f32 %v1458_v3, %v691_v15  ;;  %v794_v20 = vadd.f32 %v1458_v3, %v723_v16  ;;  %v1109_v21 = vpop.f32.mrb[26].mxu0  ;;  %v1157_v22 = vpop.f32.mrb[26].mxu1 }
 0x10d   :  { %v827_v23 = vmax.f32 %v763_v17, 0.0  ;;  %v859_v24 = vmax.f32 %v795_v18, 0.0  ;;  %v694_v25 = vmul.f32 %v1109_v21, %v1453_v1  ;;  %v726_v26 = vmul.f32 %v1157_v22, %v1453_v1  ;;  %v471_v27 = vpop.f32.mrb[27].mxu0  ;;  %v631_v28 = vpop.f32.mrb[27].mxu1 }
 0x10e   :  { %v826_v29 = vmax.f32 %v762_v19, 0.0  ;;  %v858_v30 = vmax.f32 %v794_v20, 0.0  ;;  %v693_v31 = vmul.f32 %v1453_v1, %v471_v27  ;;  %v725_v32 = vmul.f32 %v1453_v1, %v631_v28 }
 0x10f   :  { %892 = vst.msk [vmem:[%s1848_s4 + $0xc8] sm:$0xff] %vm866_vm1, %v827_v23  ;;  %924 = vst.msk [vmem:[%s1848_s4 + $0x1c8] sm:$0xff] %vm866_vm1, %v859_v24  ;;  %v765_v33 = vadd.f32 %v1458_v3, %v694_v25  ;;  %v797_v34 = vadd.f32 %v1458_v3, %v726_v26 }
 0x110   :  { %891 = vst.msk [vmem:[%s1848_s4 + $0xc0] sm:$0xff] %vm866_vm1, %v826_v29  ;;  %923 = vst.msk [vmem:[%s1848_s4 + $0x1c0] sm:$0xff] %vm866_vm1, %v858_v30  ;;  %v764_v35 = vadd.f32 %v1458_v3, %v693_v31  ;;  %v796_v36 = vadd.f32 %v1458_v3, %v725_v32  ;;  %v1112_v37 = vpop.f32.mrb[28].mxu0  ;;  %v1160_v38 = vpop.f32.mrb[28].mxu1 }
 0x111   :  { %v829_v39 = vmax.f32 %v765_v33, 0.0  ;;  %v861_v40 = vmax.f32 %v797_v34, 0.0  ;;  %v696_v41 = vmul.f32 %v1112_v37, %v1453_v1  ;;  %v728_v42 = vmul.f32 %v1160_v38, %v1453_v1  ;;  %v481_v43 = vpop.f32.mrb[29].mxu0  ;;  %v641_v44 = vpop.f32.mrb[29].mxu1 }
 0x112   :  { %v828_v45 = vmax.f32 %v764_v35, 0.0  ;;  %v860_v46 = vmax.f32 %v796_v36, 0.0  ;;  %v695_v47 = vmul.f32 %v1453_v1, %v481_v43  ;;  %v727_v48 = vmul.f32 %v1453_v1, %v641_v44 }
 0x113   :  { %894 = vst.msk [vmem:[%s1848_s4 + $0xd8] sm:$0xff] %vm866_vm1, %v829_v39  ;;  %926 = vst.msk [vmem:[%s1848_s4 + $0x1d8] sm:$0xff] %vm866_vm1, %v861_v40  ;;  %v767_v49 = vadd.f32 %v1458_v3, %v696_v41  ;;  %v799_v50 = vadd.f32 %v1458_v3, %v728_v42 }
 0x114   :  { %893 = vst.msk [vmem:[%s1848_s4 + $0xd0] sm:$0xff] %vm866_vm1, %v828_v45  ;;  %925 = vst.msk [vmem:[%s1848_s4 + $0x1d0] sm:$0xff] %vm866_vm1, %v860_v46  ;;  %v766_v51 = vadd.f32 %v1458_v3, %v695_v47  ;;  %v798_v52 = vadd.f32 %v1458_v3, %v727_v48  ;;  %v1115_v53 = vpop.f32.mrb[30].mxu0  ;;  %v1163_v54 = vpop.f32.mrb[30].mxu1 }
 0x115   :  { %v831_v55 = vmax.f32 %v767_v49, 0.0  ;;  %v863_v56 = vmax.f32 %v799_v50, 0.0  ;;  %v698_v57 = vmul.f32 %v1115_v53, %v1453_v1  ;;  %v730_v58 = vmul.f32 %v1163_v54, %v1453_v1  ;;  %v491_v59 = vpop.f32.mrb[31].mxu0  ;;  %v651_v60 = vpop.f32.mrb[31].mxu1 }
 0x116   :  { %v830_v61 = vmax.f32 %v766_v51, 0.0  ;;  %v862_v62 = vmax.f32 %v798_v52, 0.0  ;;  %v697_v63 = vmul.f32 %v1453_v1, %v491_v59  ;;  %v729_v0 = vmul.f32 %v1453_v1, %v651_v60 }
 0x117   :  { %896 = vst.msk [vmem:[%s1848_s4 + $0xe8] sm:$0xff] %vm866_vm1, %v831_v55  ;;  %928 = vst.msk [vmem:[%s1848_s4 + $0x1e8] sm:$0xff] %vm866_vm1, %v863_v56  ;;  %v769_v2 = vadd.f32 %v1458_v3, %v698_v57  ;;  %v801_v4 = vadd.f32 %v1458_v3, %v730_v58 }
 0x118   :  { %895 = vst.msk [vmem:[%s1848_s4 + $0xe0] sm:$0xff] %vm866_vm1, %v830_v61  ;;  %927 = vst.msk [vmem:[%s1848_s4 + $0x1e0] sm:$0xff] %vm866_vm1, %v862_v62  ;;  %v768_v1 = vadd.f32 %v1458_v3, %v697_v63  ;;  %v800_v5 = vadd.f32 %v1458_v3, %v729_v0 }
 0x119   :  { %v833_v6 = vmax.f32 %v769_v2, 0.0  ;;  %v865_v7 = vmax.f32 %v801_v4, 0.0 }
 0x11a   :  { %v832_v8 = vmax.f32 %v768_v1, 0.0  ;;  %v864_v9 = vmax.f32 %v800_v5, 0.0 }
 0x11b   :  { %898 = vst.msk [vmem:[%s1848_s4 + $0xf8] sm:$0xff] %vm866_vm1, %v833_v6  ;;  %930 = vst.msk [vmem:[%s1848_s4 + $0x1f8] sm:$0xff] %vm866_vm1, %v865_v7 }
 0x11c   :  { %897 = vst.msk [vmem:[%s1848_s4 + $0xf0] sm:$0xff] %vm866_vm1, %v832_v8  ;;  %929 = vst.msk [vmem:[%s1848_s4 + $0x1f0] sm:$0xff] %vm866_vm1, %v864_v9 }

</bundles_post_ra>
